<compile_context>
chip_gen: v6e
topology: v6e:2x2x1
jax: 0.10.0
libtpu: 0.0.40
codegen_flags: <defaults>
</compile_context>

<pallas_src>
import functools

import jax
import jax.numpy as jnp
from jax.experimental import pallas as pl
from jax.experimental.pallas import tpu as pltpu


def _round_up(x, m):
    return ((x + m - 1) // m) * m


def _itemsize(dt):
    return jnp.finfo(dt).bits // 8


def _vmem_limit_bytes():
    """Generation-aware scoped-VMEM budget (v7x: 64 MiB physical; v5e/v6e: 128 MiB)."""
    cap = 128 * 1024 * 1024
    try:
        cap = int(getattr(pltpu.get_tpu_info(), "vmem_capacity_bytes", cap))
    except Exception:  # best-effort hardware query; fall back to 128 MiB
        pass
    return min(int(cap * 3 // 4), 100 * 1024 * 1024)


_VMEM_LIMIT = _vmem_limit_bytes()


def _compiler_params(sem):
    return pltpu.CompilerParams(dimension_semantics=sem, vmem_limit_bytes=_VMEM_LIMIT)


# ----------------------------------------------------------------------------
# Tile / band pickers
# ----------------------------------------------------------------------------
def _pick_tile_m(m, tm_max=512):
    """Row tile for the pointwise GEMMs: multiple of 8 sublanes, >=2 grid steps."""
    half = -(-m // 2)
    return max(8, min(tm_max, _round_up(half, 8)))


def _pick_divisor_tile(rows, tm_max=512):
    """Largest multiple-of-8 tile that divides `rows` (needed for the fused GAP)."""
    d = min(tm_max, rows)
    d -= d % 8
    while d >= 8:
        if rows % d == 0:
            return d
        d -= 8
    return None


def _pick_band(h, w, cout, *, acc_budget=256 * 1024):
    """Largest multiple-of-8 row band dividing H whose f32 accumulator fits the
    budget, preferring >=2 bands per image (pipelining + v7x megacore)."""
    # TODO(synk): generic (non multiple-of-8) heights need a padded fallback path.
    assert h % 8 == 0, "row-band tiling requires H % 8 == 0"
    cands = [d for d in range(8, h + 1, 8) if h % d == 0]
    ok = [d for d in cands if d * w * cout * 4 <= acc_budget] or [8]
    ge2 = [d for d in ok if h // d >= 2]
    return max(ge2) if ge2 else max(ok)


# ----------------------------------------------------------------------------
# 1x1 conv + folded BN (+ optional LeakyReLU), optionally with a fused
# global-average-pool partial-sum output.
# ----------------------------------------------------------------------------
def _pw_kernel(x_ref, w_ref, shift_ref, o_ref, *, act):
    y = jnp.dot(x_ref[...], w_ref[...], preferred_element_type=jnp.float32)
    y = y + shift_ref[...]                               # BN shift (scale folded into w)
    if act == "leaky":
        y = jnp.where(y >= 0.0, y, 0.1 * y)
    o_ref[...] = y.astype(o_ref.dtype)


def _pw_kernel_fused_sum(x_ref, w_ref, shift_ref, o_ref, sum_ref, *, act):
    y = jnp.dot(x_ref[...], w_ref[...], preferred_element_type=jnp.float32)
    y = y + shift_ref[...]
    if act == "leaky":
        y = jnp.where(y >= 0.0, y, 0.1 * y)
    o_ref[...] = y.astype(o_ref.dtype)
    # per-block partial channel sums (f32) -> fused global average pool
    sum_ref[...] = jnp.sum(y, axis=0).reshape(1, 1, -1)


def pointwise_conv_bn(x2d, w_mat, shift, *, act="none", out_dtype=jnp.bfloat16,
                      tm_max=512, fuse_sum_rows=None):
    """(M, Cin) @ (Cin, Cout) + BN shift (+ LeakyReLU).  When `fuse_sum_rows`
    (= H*W per image) admits a dividing tile, also emits per-block channel
    partial sums for the channel-attention global average pool."""
    m, cin = x2d.shape
    cout = w_mat.shape[1]
    x2d = x2d.astype(jnp.bfloat16)
    w_mat = w_mat.astype(jnp.bfloat16)
    shift = shift.reshape(1, cout).astype(jnp.float32)

    tm = _pick_divisor_tile(fuse_sum_rows, tm_max) if fuse_sum_rows is not None else None
    fused = tm is not None
    if tm is None:
        tm = _pick_tile_m(m, tm_max)
    grid = (pl.cdiv(m, tm),)
    nblk = grid[0]

    in_specs = [
        pl.BlockSpec((tm, cin), lambda i: (i, 0)),
        pl.BlockSpec((cin, cout), lambda i: (0, 0)),
        pl.BlockSpec((1, cout), lambda i: (0, 0)),
    ]
    cost = pl.CostEstimate(
        flops=int(2 * m * cin * cout), transcendentals=0,
        bytes_accessed=int(m * cin * 2 + cin * cout * 2 + cout * 4
                           + m * cout * _itemsize(out_dtype)))

    if fused:
        y, psum = pl.pallas_call(
            functools.partial(_pw_kernel_fused_sum, act=act),
            out_shape=(jax.ShapeDtypeStruct((m, cout), out_dtype),
                       jax.ShapeDtypeStruct((nblk, 1, cout), jnp.float32)),
            grid_spec=pltpu.PrefetchScalarGridSpec(
                num_scalar_prefetch=0, grid=grid, in_specs=in_specs,
                out_specs=[pl.BlockSpec((tm, cout), lambda i: (i, 0)),
                           pl.BlockSpec((1, 1, cout), lambda i: (i, 0, 0))]),
            compiler_params=_compiler_params(("parallel",)),
            cost_estimate=cost,
        )(x2d, w_mat, shift)
        return y, psum

    y = pl.pallas_call(
        functools.partial(_pw_kernel, act=act),
        out_shape=jax.ShapeDtypeStruct((m, cout), out_dtype),
        grid_spec=pltpu.PrefetchScalarGridSpec(
            num_scalar_prefetch=0, grid=grid, in_specs=in_specs,
            out_specs=pl.BlockSpec((tm, cout), lambda i: (i, 0))),
        compiler_params=_compiler_params(("parallel",)),
        cost_estimate=cost,
    )(x2d, w_mat, shift)
    return (y, None) if fuse_sum_rows is not None else y


# ----------------------------------------------------------------------------
# 3x3 / stride-1 conv + folded BN + LeakyReLU, row-band tiled with a 2-row halo.
# Input is zero-padded (H+2, W+2) once on the host, so the kernel does no zero
# fill and the halo is expressed with plain, non-overlapping BlockSpecs.
# ----------------------------------------------------------------------------
def _conv3x3_kernel(xm_ref, xh_ref, w_ref, shift_ref, o_ref, slab_ref,
                    *, th, ww, neg_slope):
    cin = xm_ref.shape[-1]
    cout = o_ref.shape[-1]
    # Assemble the (TH+2, W+2, Cin) bf16 band slab: TH main rows + 2 halo rows.
    slab_ref[0:th] = xm_ref[0]
    slab_ref[th:th + 2] = xh_ref[0]
    acc = jnp.zeros((th * ww, cout), jnp.float32)
    for di in range(3):
        # im2col along w: 3 matmuls with K = 3*Cin instead of 9 with K = Cin.
        a = jnp.concatenate(
            [slab_ref[di:di + th, dj:dj + ww, :].reshape(th * ww, cin)
             for dj in range(3)], axis=-1)
        acc = acc + jnp.dot(a, w_ref[di], preferred_element_type=jnp.float32)
    y = acc + shift_ref[...]
    y = jnp.where(y >= 0.0, y, neg_slope * y)
    o_ref[0] = y.reshape(th, ww, cout).astype(o_ref.dtype)


def conv3x3_bn_lrelu(x_pad, w_kmat, shift, th, *, neg_slope=0.1, out_dtype=jnp.bfloat16):
    # TODO(synk): stride > 1 patch gather not implemented (module default stride=1).
    n, hp2, wp2, cin = x_pad.shape
    h, w = hp2 - 2, wp2 - 2
    cout = w_kmat.shape[-1]
    nb = h // th
    x_pad = x_pad.astype(jnp.bfloat16)
    cost = pl.CostEstimate(
        flops=int(2 * n * h * w * 9 * cin * cout), transcendentals=0,
        bytes_accessed=int(n * hp2 * wp2 * cin * 2 + 9 * cin * cout * 2
                           + n * h * w * cout * _itemsize(out_dtype)))
    return pl.pallas_call(
        functools.partial(_conv3x3_kernel, th=th, ww=w, neg_slope=neg_slope),
        out_shape=jax.ShapeDtypeStruct((n, h, w, cout), out_dtype),
        grid_spec=pltpu.PrefetchScalarGridSpec(
            num_scalar_prefetch=0,
            grid=(n, nb),
            in_specs=[
                # main TH padded rows of this band
                pl.BlockSpec((1, th, wp2, cin), lambda i, b: (i, b, 0, 0)),
                # 2-row bottom halo (non-overlapping 2-row blocks; TH is even)
                pl.BlockSpec((1, 2, wp2, cin),
                             lambda i, b: (i, (b + 1) * (th // 2), 0, 0)),
                pl.BlockSpec((3, 3 * cin, cout), lambda i, b: (0, 0, 0)),
                pl.BlockSpec((1, cout), lambda i, b: (0, 0)),
            ],
            out_specs=pl.BlockSpec((1, th, w, cout), lambda i, b: (i, b, 0, 0)),
            scratch_shapes=[pltpu.VMEM((th + 2, wp2, cin), jnp.bfloat16)],
        ),
        compiler_params=_compiler_params(("parallel", "parallel")),
        cost_estimate=cost,
    )(x_pad, x_pad, w_kmat.astype(jnp.bfloat16),
      shift.reshape(1, cout).astype(jnp.float32))


# ----------------------------------------------------------------------------
# CBAM stats pass: channel gate -> per-pixel mean / max maps, lane dim = W.
# ----------------------------------------------------------------------------
def _cbam_stats_kernel(y3_ref, ca_ref, o_ref):
    y4 = y3_ref[0].astype(jnp.float32) * ca_ref[0, 0]
    o_ref[0, 0] = jnp.mean(y4, axis=-1)
    o_ref[0, 1] = jnp.max(y4, axis=-1)


def cbam_stats(y3_nhwc, ca, th):
    n, h, w, c2 = y3_nhwc.shape
    nb = h // th
    cost = pl.CostEstimate(flops=int(3 * n * h * w * c2), transcendentals=0,
                           bytes_accessed=int(n * h * w * c2 * 2 + n * 2 * h * w * 4))
    return pl.pallas_call(
        _cbam_stats_kernel,
        out_shape=jax.ShapeDtypeStruct((n, 2, h, w), jnp.float32),
        grid_spec=pltpu.PrefetchScalarGridSpec(
            num_scalar_prefetch=0,
            grid=(n, nb),
            in_specs=[
                pl.BlockSpec((1, th, w, c2), lambda i, b: (i, b, 0, 0)),
                pl.BlockSpec((1, 1, c2), lambda i, b: (i, 0, 0)),
            ],
            out_specs=pl.BlockSpec((1, 2, th, w), lambda i, b: (i, 0, b, 0)),
        ),
        compiler_params=_compiler_params(("parallel", "parallel")),
        cost_estimate=cost,
    )(y3_nhwc, ca)


# ----------------------------------------------------------------------------
# CBAM tail: 7x7 spatial-attention stencil (lane-dense, banded with an 8-row
# halo on the tiny padded stats maps) + channel gate + residual + ReLU.
# ----------------------------------------------------------------------------
def _cbam_tail_kernel(wsa_ref, y3_ref, ca_ref, res_ref, sm_ref, sh_ref, o_ref,
                      *, th, ww, ksa):
    # stats slab: (2, TH+8, W+6) f32, W on lanes -> lane-dense stencil FMAs.
    stats = jnp.concatenate([sm_ref[0], sh_ref[0]], axis=1)
    acc = jnp.zeros((th, ww), jnp.float32)
    for ch in range(2):
        for di in range(ksa):
            for dj in range(ksa):
                acc = acc + (wsa_ref[ch * ksa * ksa + di * ksa + dj]
                             * stats[ch, di:di + th, dj:dj + ww])
    sa = jax.nn.sigmoid(acc)[:, :, None]                         # (TH, W, 1)
    y4 = y3_ref[0].astype(jnp.float32) * ca_ref[0, 0]            # channel gate
    out = y4 * sa + res_ref[0].astype(jnp.float32)               # residual add
    o_ref[0] = jnp.maximum(out, 0.0).astype(o_ref.dtype)         # ReLU


def cbam_tail(y3_nhwc, ca, res_nhwc, stats_pad, wsa_flat, th, *, ksa=7):
    n, h, w, c2 = y3_nhwc.shape
    nb = h // th
    wpad = w + 2 * (ksa // 2)
    cost = pl.CostEstimate(
        flops=int(n * h * w * (2 * ksa * ksa + 3 * c2)),
        transcendentals=int(n * h * w),
        bytes_accessed=int(2 * n * h * w * c2 * 2 + n * 2 * (h + 8) * wpad * 4
                           + n * h * w * c2 * 4))
    return pl.pallas_call(
        functools.partial(_cbam_tail_kernel, th=th, ww=w, ksa=ksa),
        out_shape=jax.ShapeDtypeStruct((n, h, w, c2), jnp.float32),
        grid_spec=pltpu.PrefetchScalarGridSpec(
            num_scalar_prefetch=1,                               # 98 7x7 weights -> SMEM
            grid=(n, nb),
            in_specs=[
                pl.BlockSpec((1, th, w, c2), lambda i, b, wsa: (i, b, 0, 0)),
                pl.BlockSpec((1, 1, c2), lambda i, b, wsa: (i, 0, 0)),
                pl.BlockSpec((1, th, w, c2), lambda i, b, wsa: (i, b, 0, 0)),
                # main TH rows of the zero-padded stats maps
                pl.BlockSpec((1, 2, th, wpad), lambda i, b, wsa: (i, 0, b, 0)),
                # 8-row bottom halo (non-overlapping; TH % 8 == 0)
                pl.BlockSpec((1, 2, 8, wpad),
                             lambda i, b, wsa: (i, 0, (b + 1) * (th // 8), 0)),
            ],
            out_specs=pl.BlockSpec((1, th, w, c2), lambda i, b, wsa: (i, b, 0, 0)),
        ),
        compiler_params=_compiler_params(("parallel", "parallel")),
        cost_estimate=cost,
    )(wsa_flat.astype(jnp.float32), y3_nhwc, ca,
      res_nhwc.astype(jnp.bfloat16), stats_pad, stats_pad)


# ----------------------------------------------------------------------------
# Full ResBlock_CBAM forward
# ----------------------------------------------------------------------------
def _fold_bn(w, bn, eps=1e-5):
    gamma, beta, mean, var = bn
    s = gamma * jax.lax.rsqrt(var + eps)
    return w * s[:, None, None, None], beta - mean * s


def resblock_cbam_forward(x_nchw, params, *, stride=1, downsampling=False, eps=1e-5):
    """ResBlock_CBAM.forward (inference-mode BatchNorm)."""
    # TODO(synk): stride > 1 (the downsampling=True, stride=2 config) not implemented.
    assert stride == 1, "only the module-default stride=1 path is implemented"
    n, cin, h, w = x_nchw.shape

    # NHWC + bf16 once at the module boundary (halves every activation read).
    x_nhwc = jnp.transpose(x_nchw, (0, 2, 3, 1)).astype(jnp.bfloat16)
    m = n * h * w

    # ---- bottleneck (BN scale folded into the conv weights) ----
    w1, s1 = _fold_bn(params["w1"], params["bn1"], eps)          # (P, Cin, 1, 1)
    w2, s2 = _fold_bn(params["w2"], params["bn2"], eps)          # (P, P, 3, 3)
    w3, s3 = _fold_bn(params["w3"], params["bn3"], eps)          # (C2, P, 1, 1)
    p_ch = w1.shape[0]
    c2 = w3.shape[0]

    y1 = pointwise_conv_bn(x_nhwc.reshape(m, cin), w1[:, :, 0, 0].T, s1,
                           act="leaky", out_dtype=jnp.bfloat16)               # (M, P)

    # zero-pad the (small) y1 once on the host: removes all in-kernel zero fill
    # and lets the banded 3x3 conv express its row halo with plain BlockSpecs.
    th_conv = _pick_band(h, w, p_ch)
    y1_pad = jnp.pad(y1.reshape(n, h, w, p_ch), ((0, 0), (1, 1), (1, 1), (0, 0)))
    y2 = conv3x3_bn_lrelu(y1_pad, w2.transpose(2, 3, 1, 0).reshape(3, 3 * p_ch, p_ch),
                          s2, th_conv, neg_slope=0.1)                         # (N,H,W,P)

    # 1x1 conv + BN with fused per-block channel sums (global average pool).
    y3, psum = pointwise_conv_bn(y2.reshape(m, p_ch), w3[:, :, 0, 0].T, s3,
                                 act="none", out_dtype=jnp.bfloat16,
                                 fuse_sum_rows=h * w)                         # (M, C2)
    y3_nhwc = y3.reshape(n, h, w, c2)

    # ---- channel attention gate (tiny O(N*C2^2) math: left to XLA) ----
    if psum is not None:
        pooled = jnp.sum(psum.reshape(n, -1, c2), axis=1) / float(h * w)
    else:
        pooled = jnp.mean(y3_nhwc.astype(jnp.float32), axis=(1, 2))
    fc = pooled @ params["w_ca"].reshape(c2, c2).T + params["b_ca"]
    ca = jax.nn.sigmoid(fc).reshape(n, 1, c2).astype(jnp.float32)             # (N,1,C2)

    # ---- residual branch ----
    if downsampling:
        wd, sd = _fold_bn(params["wd"], params["bnd"], eps)
        res = pointwise_conv_bn(x_nhwc.reshape(m, cin), wd[:, :, 0, 0].T, sd,
                                act="none", out_dtype=jnp.bfloat16).reshape(n, h, w, c2)
    else:
        assert cin == c2, "identity residual needs in_places == places * expansion"
        res = x_nhwc

    # ---- CBAM tail: banded stats pass + banded lane-dense 7x7 stencil pass ----
    th_tail = _pick_band(h, w, c2)
    stats = cbam_stats(y3_nhwc, ca, th_tail)                                  # (N,2,H,W)
    # zero padding of the stats maps == the 7x7 conv's zero padding (tiny array)
    stats_pad = jnp.pad(stats, ((0, 0), (0, 0), (3, 5), (3, 3)))
    out_nhwc = cbam_tail(y3_nhwc, ca, res, stats_pad,
                         params["w_sa"].reshape(-1), th_tail, ksa=7)
    return jnp.transpose(out_nhwc, (0, 3, 1, 2))     # NCHW only at the module boundary


# ----------------------------------------------------------------------------
# Pure-JAX reference (mirrors the PyTorch module, inference BN, f32)
# ----------------------------------------------------------------------------
def _reference(x, params, *, stride=1, downsampling=False, eps=1e-5):
    def conv(z, w, s, pad):
        return jax.lax.conv_general_dilated(
            z, w, (s, s), ((pad, pad), (pad, pad)),
            dimension_numbers=("NCHW", "OIHW", "NCHW"))

    def bn(z, b):
        gamma, beta, mean, var = b
        sc = gamma / jnp.sqrt(var + eps)
        return z * sc[None, :, None, None] + (beta - mean * sc)[None, :, None, None]

    def lrelu(z):
        return jnp.where(z >= 0, z, 0.1 * z)

    out = lrelu(bn(conv(x, params["w1"], 1, 0), params["bn1"]))
    out = lrelu(bn(conv(out, params["w2"], stride, 1), params["bn2"]))
    out = bn(conv(out, params["w3"], 1, 0), params["bn3"])
    # channel attention
    pooled = jnp.mean(out, axis=(2, 3), keepdims=True)
    fc = conv(pooled, params["w_ca"], 1, 0) + params["b_ca"][None, :, None, None]
    out = out * jax.nn.sigmoid(fc)
    # spatial attention
    stats = jnp.concatenate([jnp.mean(out, axis=1, keepdims=True),
                             jnp.max(out, axis=1, keepdims=True)], axis=1)
    out = out * jax.nn.sigmoid(conv(stats, params["w_sa"], 1, 3))
    res = x
    if downsampling:
        res = bn(conv(x, params["wd"], stride, 0), params["bnd"])
    return jnp.maximum(out + res, 0.0)


if __name__ == "__main__":
    key = jax.random.PRNGKey(0)
    ks = jax.random.split(key, 12)

    # ResBlock_CBAM(in_places=16, places=4), stride=1, downsampling=False:
    # identity residual requires in_places == places * expansion (= 16).
    N, in_places, H, W = 2, 16, 16, 16
    places, expansion = 4, 4
    C2 = places * expansion

    def bn_params(k, c):
        k1, k2, k3, k4 = jax.random.split(k, 4)
        return (1.0 + 0.1 * jax.random.normal(k1, (c,), jnp.float32),      # gamma
                0.1 * jax.random.normal(k2, (c,), jnp.float32),            # beta
                0.1 * jax.random.normal(k3, (c,), jnp.float32),            # running_mean
                jax.random.uniform(k4, (c,), jnp.float32, 0.5, 1.5))       # running_var

    params = {
        "w1": 0.1 * jax.random.normal(ks[0], (places, in_places, 1, 1), jnp.float32),
        "bn1": bn_params(ks[1], places),
        "w2": 0.1 * jax.random.normal(ks[2], (places, places, 3, 3), jnp.float32),
        "bn2": bn_params(ks[3], places),
        "w3": 0.1 * jax.random.normal(ks[4], (C2, places, 1, 1), jnp.float32),
        "bn3": bn_params(ks[5], C2),
        "w_ca": 0.1 * jax.random.normal(ks[6], (C2, C2, 1, 1), jnp.float32),
        "b_ca": 0.1 * jax.random.normal(ks[7], (C2,), jnp.float32),
        "w_sa": 0.1 * jax.random.normal(ks[8], (1, 2, 7, 7), jnp.float32),
    }
    x = jax.random.normal(ks[9], (N, in_places, H, W), jnp.float32)

    out = resblock_cbam_forward(x, params)
    out = jax.block_until_ready(out)

    ref = _reference(x, params)
    assert out.shape == ref.shape == (N, C2, H, W)
    max_err = float(jnp.max(jnp.abs(out - ref)))
    # bf16 activation streams (f32 accumulation) across the whole block -> ~1e-2 abs error
    assert jnp.allclose(out, ref, atol=3e-2, rtol=3e-2), \
        f"mismatch vs reference (max err {max_err:.5f})"

    print("KERNEL_OK")
</pallas_src>

<mosaic_0001>
module attributes {stable_mosaic.version = 11 : i64} {
  func.func @_pw_kernel(%arg0: i32, %arg1: memref<256x16xbf16, #tpu.memory_space<vmem>>, %arg2: memref<16x4xbf16, #tpu.memory_space<vmem>>, %arg3: memref<1x4xf32, #tpu.memory_space<vmem>>, %arg4: memref<256x4xbf16, #tpu.memory_space<vmem>>) attributes {dimension_semantics = [#tpu.dimension_semantics<parallel>], iteration_bounds = array<i64: 2>, scalar_prefetch = 0 : i64, scratch_operands = 0 : i64, tpu.core_type = #tpu.core_type<tc>, window_params = [{transform_indices = @transform_0, window_bounds = array<i64: 256, 16>}, {pipeline_mode = #tpu.pipeline_mode<synchronous>, transform_indices = @transform_1, window_bounds = array<i64: 16, 4>}, {pipeline_mode = #tpu.pipeline_mode<synchronous>, transform_indices = @transform_2, window_bounds = array<i64: 1, 4>}, {transform_indices = @transform_3, window_bounds = array<i64: 256, 4>}]} {
    %c0 = arith.constant 0 : index
    %c0_0 = arith.constant 0 : index
    %0 = vector.load %arg1[%c0, %c0_0] : memref<256x16xbf16, #tpu.memory_space<vmem>>, vector<256x16xbf16>
    %c0_1 = arith.constant 0 : index
    %c0_2 = arith.constant 0 : index
    %1 = vector.load %arg2[%c0_1, %c0_2] : memref<16x4xbf16, #tpu.memory_space<vmem>>, vector<16x4xbf16>
    %cst = arith.constant dense<0.000000e+00> : vector<256x4xf32>
    %2 = tpu.matmul %0, %1, %cst {dimension_numbers = #tpu.dot_dimension_numbers<[1], [0], [0], [1], [0, 0, 1, 1], [], []>} : vector<256x16xbf16>, vector<16x4xbf16>, vector<256x4xf32> -> vector<256x4xf32>
    %c0_3 = arith.constant 0 : index
    %c0_4 = arith.constant 0 : index
    %3 = vector.load %arg3[%c0_3, %c0_4] : memref<1x4xf32, #tpu.memory_space<vmem>>, vector<1x4xf32>
    %4 = vector.broadcast %3 : vector<1x4xf32> to vector<256x4xf32>
    %5 = arith.addf %2, %4 : vector<256x4xf32>
    %cst_5 = arith.constant 0.000000e+00 : f32
    %6 = vector.broadcast %cst_5 : f32 to vector<256x4xf32>
    %7 = arith.cmpf oge, %5, %6 : vector<256x4xf32>
    %cst_6 = arith.constant 1.000000e-01 : f32
    %8 = vector.broadcast %cst_6 : f32 to vector<256x4xf32>
    %9 = arith.mulf %8, %5 : vector<256x4xf32>
    %10 = arith.select %7, %5, %9 : vector<256x4xi1>, vector<256x4xf32>
    %11 = arith.truncf %10 : vector<256x4xf32> to vector<256x4xbf16>
    %c0_7 = arith.constant 0 : index
    %c0_8 = arith.constant 0 : index
    %12 = vector.load %arg4[%c0_7, %c0_8] : memref<256x4xbf16, #tpu.memory_space<vmem>>, vector<256x4xbf16>
    tpu.vector_store %arg4[%c0_7, %c0_8], %11 {strides = array<i32>} : memref<256x4xbf16, #tpu.memory_space<vmem>>, vector<256x4xbf16>,
    return
  }
  func.func @transform_0(%arg0: i32) -> (i32, i32) {
    %c0_i32 = arith.constant 0 : i32
    %c0_i32_0 = arith.constant 0 : i32
    return %arg0, %c0_i32 : i32, i32
  }
  func.func @transform_1(%arg0: i32) -> (i32, i32) {
    %c0_i32 = arith.constant 0 : i32
    %c0_i32_0 = arith.constant 0 : i32
    %c0_i32_1 = arith.constant 0 : i32
    return %c0_i32, %c0_i32_0 : i32, i32
  }
  func.func @transform_2(%arg0: i32) -> (i32, i32) {
    %c0_i32 = arith.constant 0 : i32
    %c0_i32_0 = arith.constant 0 : i32
    %c0_i32_1 = arith.constant 0 : i32
    return %c0_i32, %c0_i32_0 : i32, i32
  }
  func.func @transform_3(%arg0: i32) -> (i32, i32) {
    %c0_i32 = arith.constant 0 : i32
    %c0_i32_0 = arith.constant 0 : i32
    return %arg0, %c0_i32 : i32, i32
  }
}

</mosaic_0001>

<bundles_post_ra>
// kernel: tpu_custom_call.1
= control target key start
LH: loop header
LB: loop body
LE: loop exit
PB: predicated region body
PF: predicated region fallthrough
CT: control target
= control target key end

     0   :  { %s1040_s12 = smov 0   ;;  %s1205_s0 = inlined_call_operand.vmem [shape: bf16[512,16], index: 0, kind: input, shape index: {}]   ;;  %s1206_s1 = inlined_call_operand.vmem [shape: bf16[16,4], index: 1, kind: input, shape index: {}]   ;;  %s1207_s2 = inlined_call_operand.vmem [shape: f32[1,4], index: 2, kind: input, shape index: {}]   ;;  %s1208_s3 = inlined_call_operand.vmem [shape: bf16[512,4], index: 3, kind: output, shape index: {}]  }
   0x1 LB: > { %s825_s13 = sadd.s32 4294967295, %s1018_s12   ;;  %p829_p0 = scmp.ge.s32.totalorder %s1018_s12, 1  ;;  %s1018_s12 = sphi %s1040_s12, %s13_s12  }
   0x2   : > { %p138_p1 = scmp.lt.s32.totalorder %s1018_s12, 3 }
   0x4   : > { %p139_p2 = pnand %p829_p0, %p138_p1 }
   0x5   : > { %s830_s16 = sshll.u32 (!%p139_p2), %s825_s13, 5 }
   0x6   : > { %142 = sbr.rel (%p139_p2) target bundleno = 255 (0xff), region = 32  ;;  %p163_p3 = scmp.lt.s32.totalorder (!%p139_p2), %s830_s16, 63 }
   0xb   : > { %v995_v0 = vld [vmem:[%s1206_s1] sm:$0xff]   ;;  %s1210_s16 = smov (!%p163_p3, %s830_s16), 63  ;;  %vm302_vm0 = vcmask 130048   ;;  %vm736_vm2 = vcmask 27648  }
   0xc   : > { %951 = vmatprep.subr.bf16.mxu0 %v995_v0  ;;  %985 = vmatprep.subr.bf16.mxu1 %v995_v0  ;;  %s831_s17 = sshll.u32 %s1210_s16, 2  ;;  %v1096_v17 = vld [vmem:[%s1207_s2] ss:$0 sm:$0xff] }
   0xd   : > { %952 = vmatpush3.bf16.msra.mxu0 %v995_v0  ;;  %986 = vmatpush3.bf16.msra.mxu1 %v995_v0  ;;  %s1059_s20 = scalar_lea.vmem %s1205_s0, %s831_s17  ;;  %s1107_s25 = scalar_lea.vmem %s1208_s3, %s831_s17 }
   0xe   : > { %v996_v1 = vld [vmem:[%s1059_s20] sm:$0xff]   ;;  %v998_v3 = vld [vmem:[%s1059_s20 + $0x8] sm:$0xff]   ;;  %v1000_v5 = vld [vmem:[%s1059_s20 + $0x10] sm:$0xff]  }
   0xf   : > { %v997_v2 = vld [vmem:[%s1059_s20 + $0x40] sm:$0xff]   ;;  %953 = vmatprep.mubr.msk.bf16.mxu0 %vm302_vm0, %v996_v1  ;;  %v999_v4 = vld [vmem:[%s1059_s20 + $0x48] sm:$0xff]   ;;  %v1001_v6 = vld [vmem:[%s1059_s20 + $0x50] sm:$0xff]  }
  0x10   : > { %969 = vmatprep.mubr.msk.bf16.mxu1 %vm302_vm0, %v997_v2  ;;  %954 = vmatmul.mubr.msk.bf16.vlgmr.msra.gmra.mxu0 %vm302_vm0, %v998_v3  ;;  %v1002_v7 = vld [vmem:[%s1059_s20 + $0x18] sm:$0xff]   ;;  %v1004_v9 = vld [vmem:[%s1059_s20 + $0x20] sm:$0xff]   ;;  %v1006_v11 = vld [vmem:[%s1059_s20 + $0x28] sm:$0xff]  }
  0x11   : > { %970 = vmatmul.mubr.msk.bf16.vlgmr.msra.gmra.mxu1 %vm302_vm0, %v999_v4  ;;  %957 = vmatprep.mubr.msk.bf16.mxu0 %vm302_vm0, %v1000_v5  ;;  %v1003_v8 = vld [vmem:[%s1059_s20 + $0x58] sm:$0xff]   ;;  %v1005_v10 = vld [vmem:[%s1059_s20 + $0x60] sm:$0xff]   ;;  %v1007_v12 = vld [vmem:[%s1059_s20 + $0x68] sm:$0xff]  }
  0x12   : > { %973 = vmatprep.mubr.msk.bf16.mxu1 %vm302_vm0, %v1001_v6  ;;  %v1008_v13 = vld [vmem:[%s1059_s20 + $0x30] sm:$0xff]   ;;  %v1010_v15 = vld [vmem:[%s1059_s20 + $0x38] sm:$0xff]  }
  0x13   : > { %v1009_v14 = vld [vmem:[%s1059_s20 + $0x70] sm:$0xff]   ;;  %v1011_v16 = vld [vmem:[%s1059_s20 + $0x78] sm:$0xff]  }
  0x18   : > { %958 = vmatmul.mubr.msk.bf16.gmra.mxu0 %vm302_vm0, %v1002_v7 }
  0x19   : > { %974 = vmatmul.mubr.msk.bf16.gmra.mxu1 %vm302_vm0, %v1003_v8  ;;  %961 = vmatprep.mubr.msk.bf16.mxu0 %vm302_vm0, %v1004_v9 }
  0x1a   : > { %977 = vmatprep.mubr.msk.bf16.mxu1 %vm302_vm0, %v1005_v10 }
  0x20   : > { %962 = vmatmul.mubr.msk.bf16.gmra.mxu0 %vm302_vm0, %v1006_v11 }
  0x21   : > { %978 = vmatmul.mubr.msk.bf16.gmra.mxu1 %vm302_vm0, %v1007_v12  ;;  %965 = vmatprep.mubr.msk.bf16.mxu0 %vm302_vm0, %v1008_v13 }
  0x22   : > { %981 = vmatprep.mubr.msk.bf16.mxu1 %vm302_vm0, %v1009_v14 }
  0x28   : > { %966 = vmatmul.mubr.msk.bf16.gmra.mxu0 %vm302_vm0, %v1010_v15 }
  0x29   : > { %982 = vmatmul.mubr.msk.bf16.gmra.mxu1 %vm302_vm0, %v1011_v16 }
  0xd0   : > { %v955_v18 = vpop.f32.mrf.mxu0 }
  0xd1   : > { %v394_v19 = vadd.f32 %v955_v18, %v1096_v17  ;;  %v971_v20 = vpop.f32.mrf.mxu1 }
  0xd2   : > { %v458_v21 = vadd.f32 %v971_v20, %v1096_v17  ;;  %v385_v22 = vpop.f32.mrf.mxu0 }
  0xd3   : > { %vm514_vm1 = vcmp.ge.f32.partialorder %v394_v19, 0.0  ;;  %v546_v23 = vmul.f32 0.1, %v394_v19  ;;  %v386_v24 = vadd.f32 %v1096_v17, %v385_v22  ;;  %v449_v25 = vpop.f32.mrf.mxu1 }
  0xd4   : > { %vm530_vm3 = vcmp.ge.f32.partialorder %v458_v21, 0.0  ;;  %v562_v26 = vmul.f32 0.1, %v458_v21  ;;  %v450_v27 = vadd.f32 %v1096_v17, %v449_v25  ;;  %v956_v28 = vpop.f32.mrf.mxu0 }
  0xd5   : > { %v578_v29 = vsel %vm514_vm1, %v394_v19, %v546_v23  ;;  %vm512_vm4 = vcmp.ge.f32.partialorder %v386_v24, 0.0  ;;  %v544_v30 = vmul.f32 0.1, %v386_v24  ;;  %v397_v31 = vadd.f32 %v956_v28, %v1096_v17  ;;  %v972_v32 = vpop.f32.mrf.mxu1 }
  0xd6   : > { %v904_v33 = vpack.c.bf16 %v578_v29, %v578_v29  ;;  %v594_v34 = vsel %vm530_vm3, %v458_v21, %v562_v26  ;;  %vm528_vm5 = vcmp.ge.f32.partialorder %v450_v27, 0.0  ;;  %v560_v35 = vmul.f32 0.1, %v450_v27  ;;  %v388_v36 = vpop.f32.mrf.mxu0 }
  0xd7   : > { %v920_v37 = vpack.c.bf16 %v594_v34, %v594_v34  ;;  %v576_v38 = vsel %vm512_vm4, %v386_v24, %v544_v30  ;;  %vm515_vm6 = vcmp.ge.f32.partialorder %v397_v31, 0.0  ;;  %v547_v39 = vmul.f32 0.1, %v397_v31  ;;  %v452_v40 = vpop.f32.mrf.mxu1 }
  0xd8   : > { %739 = vst.msk [vmem:[%s1107_s25 + $0x8] sm:$0xf] %vm736_vm2, %v904_v33  ;;  %v902_v41 = vpack.c.bf16 %v576_v38, %v576_v38  ;;  %v592_v42 = vsel %vm528_vm5, %v450_v27, %v560_v35  ;;  %v461_v43 = vadd.f32 %v972_v32, %v1096_v17  ;;  %v389_v44 = vadd.f32 %v1096_v17, %v388_v36  ;;  %v959_v45 = vpop.f32.mrf.mxu0 }
  0xd9   : > { %755 = vst.msk [vmem:[%s1107_s25 + $0x48] sm:$0xf] %vm736_vm2, %v920_v37  ;;  %v918_v46 = vpack.c.bf16 %v592_v42, %v592_v42  ;;  %v579_v47 = vsel %vm515_vm6, %v397_v31, %v547_v39  ;;  %v453_v48 = vadd.f32 %v1096_v17, %v452_v40  ;;  %v410_v49 = vadd.f32 %v959_v45, %v1096_v17  ;;  %v975_v50 = vpop.f32.mrf.mxu1 }
  0xda   : > { %737 = vst.msk [vmem:[%s1107_s25] sm:$0xf] %vm736_vm2, %v902_v41  ;;  %v905_v51 = vpack.c.bf16 %v579_v47, %v579_v47  ;;  %vm531_vm7 = vcmp.ge.f32.partialorder %v461_v43, 0.0  ;;  %v563_v52 = vmul.f32 0.1, %v461_v43  ;;  %vm513_vm8 = vcmp.ge.f32.partialorder %v389_v44, 0.0  ;;  %v401_v53 = vpop.f32.mrf.mxu0 }
  0xdb   : > { %753 = vst.msk [vmem:[%s1107_s25 + $0x40] sm:$0xf] %vm736_vm2, %v918_v46  ;;  %v545_v54 = vmul.f32 0.1, %v389_v44  ;;  %vm529_vm9 = vcmp.ge.f32.partialorder %v453_v48, 0.0  ;;  %vm518_vm10 = vcmp.ge.f32.partialorder %v410_v49, 0.0  ;;  %v465_v56 = vpop.f32.mrf.mxu1  ;;  %v474_v59 = vadd.f32 %v975_v50, %v1096_v17 }
  0xdc   : > { %v561_v55 = vmul.f32 0.1, %v453_v48  ;;  %740 = vst.msk [vmem:[%s1107_s25 + $0xc] sm:$0xf] %vm736_vm2, %v905_v51  ;;  %v595_v57 = vsel %vm531_vm7, %v461_v43, %v563_v52  ;;  %v550_v58 = vmul.f32 0.1, %v410_v49  ;;  %v402_v60 = vadd.f32 %v1096_v17, %v401_v53  ;;  %v960_v61 = vpop.f32.mrf.mxu0 }
  0xdd   : > { %v921_v62 = vpack.c.bf16 %v595_v57, %v595_v57  ;;  %v577_v63 = vsel %vm513_vm8, %v389_v44, %v545_v54  ;;  %v466_v1 = vadd.f32 %v1096_v17, %v465_v56  ;;  %v976_v2 = vpop.f32.mrf.mxu1  ;;  %vm534_vm11 = vcmp.ge.f32.partialorder %v474_v59, 0.0 }
  0xde   : > { %v593_v0 = vsel %vm529_vm9, %v453_v48, %v561_v55  ;;  %v903_v3 = vpack.c.bf16 %v577_v63, %v577_v63  ;;  %v582_v5 = vsel %vm518_vm10, %v410_v49, %v550_v58  ;;  %v404_v6 = vpop.f32.mrf.mxu0  ;;  %v566_v8 = vmul.f32 0.1, %v474_v59 }
  0xdf   : > { %v919_v4 = vpack.c.bf16 %v593_v0, %v593_v0  ;;  %756 = vst.msk [vmem:[%s1107_s25 + $0x4c] sm:$0xf] %vm736_vm2, %v921_v62  ;;  %v908_v7 = vpack.c.bf16 %v582_v5, %v582_v5  ;;  %vm516_vm12 = vcmp.ge.f32.partialorder %v402_v60, 0.0  ;;  %v548_v9 = vmul.f32 0.1, %v402_v60  ;;  %v468_v10 = vpop.f32.mrf.mxu1 }
  0xe0   : > { %738 = vst.msk [vmem:[%s1107_s25 + $0x4] sm:$0xf] %vm736_vm2, %v903_v3  ;;  %vm532_vm13 = vcmp.ge.f32.partialorder %v466_v1, 0.0  ;;  %v564_v11 = vmul.f32 0.1, %v466_v1  ;;  %v413_v12 = vadd.f32 %v960_v61, %v1096_v17  ;;  %v477_v13 = vadd.f32 %v976_v2, %v1096_v17  ;;  %v963_v14 = vpop.f32.mrf.mxu0 }
  0xe1   : > { %754 = vst.msk [vmem:[%s1107_s25 + $0x44] sm:$0xf] %vm736_vm2, %v919_v4  ;;  %743 = vst.msk [vmem:[%s1107_s25 + $0x18] sm:$0xf] %vm736_vm2, %v908_v7  ;;  %v598_v15 = vsel %vm534_vm11, %v474_v59, %v566_v8  ;;  %v580_v16 = vsel %vm516_vm12, %v402_v60, %v548_v9  ;;  %v405_v18 = vadd.f32 %v1096_v17, %v404_v6  ;;  %v979_v20 = vpop.f32.mrf.mxu1 }
  0xe2   : > { %v469_v19 = vadd.f32 %v1096_v17, %v468_v10  ;;  %v924_v21 = vpack.c.bf16 %v598_v15, %v598_v15  ;;  %v906_v22 = vpack.c.bf16 %v580_v16, %v580_v16  ;;  %v596_v23 = vsel %vm532_vm13, %v466_v1, %v564_v11  ;;  %v417_v24 = vpop.f32.mrf.mxu0 }
  0xe3   : > { %vm519_vm14 = vcmp.ge.f32.partialorder %v413_v12, 0.0  ;;  %v922_v25 = vpack.c.bf16 %v596_v23, %v596_v23  ;;  %v551_v26 = vmul.f32 0.1, %v413_v12  ;;  %vm535_vm15 = vcmp.ge.f32.partialorder %v477_v13, 0.0  ;;  %v481_v28 = vpop.f32.mrf.mxu1 }
  0xe4   : > { %v567_v27 = vmul.f32 0.1, %v477_v13  ;;  %759 = vst.msk [vmem:[%s1107_s25 + $0x58] sm:$0xf] %vm736_vm2, %v924_v21  ;;  %741 = vst.msk [vmem:[%s1107_s25 + $0x10] sm:$0xf] %vm736_vm2, %v906_v22  ;;  %v964_v31 = vpop.f32.mrf.mxu0  ;;  %v426_v34 = vadd.f32 %v963_v14, %v1096_v17  ;;  %v490_v35 = vadd.f32 %v979_v20, %v1096_v17  ;;  %v418_v47 = vadd.f32 %v1096_v17, %v417_v24 }
  0xe5   : > { %vm517_vm0 = vcmp.ge.f32.partialorder %v405_v18, 0.0  ;;  %v549_v29 = vmul.f32 0.1, %v405_v18  ;;  %vm533_vm1 = vcmp.ge.f32.partialorder %v469_v19, 0.0  ;;  %v565_v30 = vmul.f32 0.1, %v469_v19  ;;  %v980_v36 = vpop.f32.mrf.mxu1 }
  0xe6   : > { %757 = vst.msk [vmem:[%s1107_s25 + $0x50] sm:$0xf] %vm736_vm2, %v922_v25  ;;  %v583_v32 = vsel %vm519_vm14, %v413_v12, %v551_v26  ;;  %v599_v33 = vsel %vm535_vm15, %v477_v13, %v567_v27  ;;  %v420_v41 = vpop.f32.mrf.mxu0  ;;  %vm522_vm3 = vcmp.ge.f32.partialorder %v426_v34, 0.0  ;;  %v554_v44 = vmul.f32 0.1, %v426_v34 }
  0xe7   : > { %v909_v37 = vpack.c.bf16 %v583_v32, %v583_v32  ;;  %v925_v38 = vpack.c.bf16 %v599_v33, %v599_v33  ;;  %v581_v39 = vsel %vm517_vm0, %v405_v18, %v549_v29  ;;  %v597_v40 = vsel %vm533_vm1, %v469_v19, %v565_v30  ;;  %v484_v45 = vpop.f32.mrf.mxu1 }
  0xe8   : > { %v907_v42 = vpack.c.bf16 %v581_v39, %v581_v39  ;;  %v923_v43 = vpack.c.bf16 %v597_v40, %v597_v40  ;;  %vm538_vm4 = vcmp.ge.f32.partialorder %v490_v35, 0.0  ;;  %v570_v46 = vmul.f32 0.1, %v490_v35  ;;  %v967_v49 = vpop.f32.mrf.mxu0 }
  0xe9   : > { %744 = vst.msk [vmem:[%s1107_s25 + $0x1c] sm:$0xf] %vm736_vm2, %v909_v37  ;;  %760 = vst.msk [vmem:[%s1107_s25 + $0x5c] sm:$0xf] %vm736_vm2, %v925_v38  ;;  %v482_v48 = vadd.f32 %v1096_v17, %v481_v28  ;;  %v586_v50 = vsel %vm522_vm3, %v426_v34, %v554_v44  ;;  %v429_v51 = vadd.f32 %v964_v31, %v1096_v17  ;;  %v983_v54 = vpop.f32.mrf.mxu1  ;;  %vm520_vm5 = vcmp.ge.f32.partialorder %v418_v47, 0.0 }
  0xea   : > { %742 = vst.msk [vmem:[%s1107_s25 + $0x14] sm:$0xf] %vm736_vm2, %v907_v42  ;;  %758 = vst.msk [vmem:[%s1107_s25 + $0x54] sm:$0xf] %vm736_vm2, %v923_v43  ;;  %v493_v52 = vadd.f32 %v980_v36, %v1096_v17  ;;  %v421_v53 = vadd.f32 %v1096_v17, %v420_v41  ;;  %v912_v55 = vpack.c.bf16 %v586_v50, %v586_v50  ;;  %v552_v57 = vmul.f32 0.1, %v418_v47  ;;  %v433_v60 = vpop.f32.mrf.mxu0 }
  0xeb   : > { %v602_v56 = vsel %vm538_vm4, %v490_v35, %v570_v46  ;;  %vm536_vm6 = vcmp.ge.f32.partialorder %v482_v48, 0.0  ;;  %v568_v59 = vmul.f32 0.1, %v482_v48  ;;  %vm523_vm7 = vcmp.ge.f32.partialorder %v429_v51, 0.0  ;;  %v497_v0 = vpop.f32.mrf.mxu1 }
  0xec   : > { %v928_v58 = vpack.c.bf16 %v602_v56, %v602_v56  ;;  %747 = vst.msk [vmem:[%s1107_s25 + $0x28] sm:$0xf] %vm736_vm2, %v912_v55  ;;  %v584_v61 = vsel %vm520_vm5, %v418_v47, %v552_v57  ;;  %v555_v62 = vmul.f32 0.1, %v429_v51  ;;  %vm539_vm8 = vcmp.ge.f32.partialorder %v493_v52, 0.0  ;;  %v968_v12 = vpop.f32.mrf.mxu0 }
  0xed   : > { %v571_v63 = vmul.f32 0.1, %v493_v52  ;;  %v910_v1 = vpack.c.bf16 %v584_v61, %v584_v61  ;;  %v600_v2 = vsel %vm536_vm6, %v482_v48, %v568_v59  ;;  %vm521_vm9 = vcmp.ge.f32.partialorder %v421_v53, 0.0  ;;  %v984_v16 = vpop.f32.mrf.mxu1 }
  0xee   : > { %763 = vst.msk [vmem:[%s1107_s25 + $0x68] sm:$0xf] %vm736_vm2, %v928_v58  ;;  %v553_v3 = vmul.f32 0.1, %v421_v53  ;;  %v926_v4 = vpack.c.bf16 %v600_v2, %v600_v2  ;;  %v587_v5 = vsel %vm523_vm7, %v429_v51, %v555_v62  ;;  %v485_v7 = vadd.f32 %v1096_v17, %v484_v45  ;;  %v436_v27 = vpop.f32.mrf.mxu0 }
  0xef   : > { %v603_v6 = vsel %vm539_vm8, %v493_v52, %v571_v63  ;;  %745 = vst.msk [vmem:[%s1107_s25 + $0x20] sm:$0xf] %vm736_vm2, %v910_v1  ;;  %v913_v8 = vpack.c.bf16 %v587_v5, %v587_v5  ;;  %v442_v11 = vadd.f32 %v967_v49, %v1096_v17  ;;  %v506_v15 = vadd.f32 %v983_v54, %v1096_v17  ;;  %v500_v31 = vpop.f32.mrf.mxu1 }
  0xf0   : > { %v929_v9 = vpack.c.bf16 %v603_v6, %v603_v6  ;;  %v585_v10 = vsel %vm521_vm9, %v421_v53, %v553_v3  ;;  %761 = vst.msk [vmem:[%s1107_s25 + $0x60] sm:$0xf] %vm736_vm2, %v926_v4  ;;  %vm537_vm10 = vcmp.ge.f32.partialorder %v485_v7, 0.0  ;;  %v569_v14 = vmul.f32 0.1, %v485_v7 }
  0xf1   : > { %v911_v13 = vpack.c.bf16 %v585_v10, %v585_v10  ;;  %748 = vst.msk [vmem:[%s1107_s25 + $0x2c] sm:$0xf] %vm736_vm2, %v913_v8  ;;  %vm526_vm11 = vcmp.ge.f32.partialorder %v442_v11, 0.0  ;;  %v558_v18 = vmul.f32 0.1, %v442_v11  ;;  %v434_v19 = vadd.f32 %v1096_v17, %v433_v60 }
  0xf2   : > { %764 = vst.msk [vmem:[%s1107_s25 + $0x6c] sm:$0xf] %vm736_vm2, %v929_v9  ;;  %v498_v20 = vadd.f32 %v1096_v17, %v497_v0  ;;  %v601_v21 = vsel %vm537_vm10, %v485_v7, %v569_v14  ;;  %vm542_vm12 = vcmp.ge.f32.partialorder %v506_v15, 0.0  ;;  %v574_v22 = vmul.f32 0.1, %v506_v15 }
  0xf3   : > { %746 = vst.msk [vmem:[%s1107_s25 + $0x24] sm:$0xf] %vm736_vm2, %v911_v13  ;;  %v445_v23 = vadd.f32 %v968_v12, %v1096_v17  ;;  %v927_v24 = vpack.c.bf16 %v601_v21, %v601_v21  ;;  %v590_v25 = vsel %vm526_vm11, %v442_v11, %v558_v18  ;;  %vm524_vm13 = vcmp.ge.f32.partialorder %v434_v19, 0.0 }
  0xf4   : > { %v556_v26 = vmul.f32 0.1, %v434_v19  ;;  %v916_v28 = vpack.c.bf16 %v590_v25, %v590_v25  ;;  %v606_v29 = vsel %vm542_vm12, %v506_v15, %v574_v22  ;;  %vm540_vm14 = vcmp.ge.f32.partialorder %v498_v20, 0.0 }
  0xf5   : > { %v572_v30 = vmul.f32 0.1, %v498_v20  ;;  %762 = vst.msk [vmem:[%s1107_s25 + $0x64] sm:$0xf] %vm736_vm2, %v927_v24  ;;  %v932_v32 = vpack.c.bf16 %v606_v29, %v606_v29  ;;  %vm527_vm15 = vcmp.ge.f32.partialorder %v445_v23, 0.0  ;;  %v509_v37 = vadd.f32 %v984_v16, %v1096_v17 }
  0xf6   : > { %v588_v33 = vsel %vm524_vm13, %v434_v19, %v556_v26  ;;  %v559_v34 = vmul.f32 0.1, %v445_v23  ;;  %751 = vst.msk [vmem:[%s1107_s25 + $0x38] sm:$0xf] %vm736_vm2, %v916_v28  ;;  %v437_v38 = vadd.f32 %v1096_v17, %v436_v27  ;;  %v501_v41 = vadd.f32 %v1096_v17, %v500_v31 }
  0xf7   : > { %v914_v35 = vpack.c.bf16 %v588_v33, %v588_v33  ;;  %v604_v36 = vsel %vm540_vm14, %v498_v20, %v572_v30  ;;  %767 = vst.msk [vmem:[%s1107_s25 + $0x78] sm:$0xf] %vm736_vm2, %v932_v32  ;;  %vm543_vm0 = vcmp.ge.f32.partialorder %v509_v37, 0.0  ;;  %v575_v43 = vmul.f32 0.1, %v509_v37 }
  0xf8   : > { %v930_v39 = vpack.c.bf16 %v604_v36, %v604_v36  ;;  %v591_v40 = vsel %vm527_vm15, %v445_v23, %v559_v34  ;;  %vm525_vm1 = vcmp.ge.f32.partialorder %v437_v38, 0.0  ;;  %v557_v44 = vmul.f32 0.1, %v437_v38 }
  0xf9   : > { %749 = vst.msk [vmem:[%s1107_s25 + $0x30] sm:$0xf] %vm736_vm2, %v914_v35  ;;  %v917_v42 = vpack.c.bf16 %v591_v40, %v591_v40  ;;  %vm541_vm3 = vcmp.ge.f32.partialorder %v501_v41, 0.0  ;;  %v573_v45 = vmul.f32 0.1, %v501_v41  ;;  %v607_v46 = vsel %vm543_vm0, %v509_v37, %v575_v43 }
  0xfa   : > { %765 = vst.msk [vmem:[%s1107_s25 + $0x70] sm:$0xf] %vm736_vm2, %v930_v39  ;;  %v933_v47 = vpack.c.bf16 %v607_v46, %v607_v46  ;;  %v589_v48 = vsel %vm525_vm1, %v437_v38, %v557_v44 }
  0xfb   : > { %752 = vst.msk [vmem:[%s1107_s25 + $0x3c] sm:$0xf] %vm736_vm2, %v917_v42  ;;  %v605_v17 = vsel %vm541_vm3, %v501_v41, %v573_v45  ;;  %v915_v49 = vpack.c.bf16 %v589_v48, %v589_v48 }
  0xfc   : > { %v931_v50 = vpack.c.bf16 %v605_v17, %v605_v17  ;;  %768 = vst.msk [vmem:[%s1107_s25 + $0x7c] sm:$0xf] %vm736_vm2, %v933_v47 }
  0xfd   : > { %750 = vst.msk [vmem:[%s1107_s25 + $0x34] sm:$0xf] %vm736_vm2, %v915_v49 }
  0xfe   : > { %766 = vst.msk [vmem:[%s1107_s25 + $0x74] sm:$0xf] %vm736_vm2, %v931_v50 }
  0xff PF: > { %s13_s12 = sadd.s32 1, %s1018_s12  }
 0x100   : > { %p10_p4 = scmp.ge.s32.totalorder %s13_s12, 4  }
 0x102   :  { %12 = sbr.rel (!%p10_p4) target bundleno = 1 (0x1), region = 62 }

</bundles_post_ra>
